<compile_context>
chip_gen: v7x
topology: tpu7x:2x2x1
jax: 0.10.0
libtpu: 0.0.40
codegen_flags: <defaults>
</compile_context>

<pallas_src>
import math
from functools import partial

import jax
import jax.numpy as jnp
from jax.experimental import pallas as pl
from jax.experimental.pallas import tpu as pltpu

PACK = 8  # batch rows packed per flat row (8 * num_state lanes; 8*16 = 128)


def _cdiv(a, b):
    return -(-a // b)


def _round_up(x, m):
    return _cdiv(x, m) * m


def _mlp_kernel(x_ref, w1_ref, b1_ref, w2_ref, b2_ref, w3_ref, b3_ref, o_ref):
    """One flat batch tile.

    x_ref : [tbf, PACK*num_state]   (PACK batch rows interleaved on lanes)
    wN_ref: block-diagonal weights [PACK*in, PACK*out] in the MXU dtype
    bN_ref: [1, PACK*out] float32 (tiled bias)
    o_ref : [tbf, PACK*num_state]
    """
    mxu = w1_ref.dtype
    x = x_ref[...].astype(mxu)                      # cast MXU lhs only; HBM stays f32

    h = jnp.dot(x, w1_ref[...], preferred_element_type=jnp.float32)
    h = jnp.maximum(h + b1_ref[...], 0.0)           # f32 intermediates, ReLU on VPU

    h = jnp.dot(h.astype(mxu), w2_ref[...], preferred_element_type=jnp.float32)
    h = jnp.maximum(h + b2_ref[...], 0.0)

    out = jnp.dot(h.astype(mxu), w3_ref[...], preferred_element_type=jnp.float32)
    o_ref[...] = (out + b3_ref[...]).astype(o_ref.dtype)


@partial(jax.jit, static_argnames=("tb", "mxu_dtype"))
def mlp_forward(x, w1, b1, w2, b2, w3, b3, *, tb=8192, mxu_dtype=jnp.bfloat16):
    """MLP forward.

    x  : [B, num_state]                 (batch-major, PyTorch-style)
    wN : [out_features, in_features]    (native nn.Linear layout)
    bN : [out_features]
    returns [B, num_state] float32
    """
    B, num_state = x.shape
    h1 = w1.shape[0]
    h2 = w2.shape[0]

    # ---- pack PACK batch rows per flat row (free row-major reshape) ----------
    Bp = _round_up(B, PACK)
    if Bp != B:  # tiny pad only when B is not a multiple of 8
        x = jnp.concatenate([x, jnp.zeros((Bp - B, num_state), x.dtype)], axis=0)
    Bf = Bp // PACK
    f_in = PACK * num_state
    x_flat = x.reshape(Bf, f_in)

    # ---- block-diagonal weights / tiled biases (tiny; VMEM-resident) ---------
    eye = jnp.eye(PACK, dtype=jnp.float32)
    w1bd = jnp.kron(eye, w1.T.astype(jnp.float32)).astype(mxu_dtype)  # [P*ns, P*h1]
    w2bd = jnp.kron(eye, w2.T.astype(jnp.float32)).astype(mxu_dtype)  # [P*h1, P*h2]
    w3bd = jnp.kron(eye, w3.T.astype(jnp.float32)).astype(mxu_dtype)  # [P*h2, P*ns]
    b1t = jnp.tile(b1.astype(jnp.float32), PACK).reshape(1, PACK * h1)
    b2t = jnp.tile(b2.astype(jnp.float32), PACK).reshape(1, PACK * h2)
    b3t = jnp.tile(b3.astype(jnp.float32), PACK).reshape(1, PACK * num_state)

    # ---- batch tiling: large lane-dense tiles, capped for v5e scoped VMEM ----
    tbf = max(8, min(tb // PACK, 2048))        # <= 2048 flat rows (16384 samples)
    tbf = min(tbf, _round_up(Bf, 8))
    tbf = _round_up(tbf, 8)
    steps = _cdiv(Bf, tbf)
    if steps > 1 and steps % 2:                # v7x megacore: prefer an even grid
        tbf = _round_up(_cdiv(Bf, steps + 1), 8)
        steps = _cdiv(Bf, tbf)

    moving = pl.BlockSpec((tbf, f_in), lambda i: (i, 0))
    resident = lambda arr: pl.BlockSpec(arr.shape, lambda i: (0, 0))

    out_flat = pl.pallas_call(
        _mlp_kernel,
        out_shape=jax.ShapeDtypeStruct((Bf, f_in), jnp.float32),
        grid=(steps,),
        in_specs=[
            moving,                             # x_flat tile (moves with grid)
            resident(w1bd), resident(b1t),      # weights/biases stay resident
            resident(w2bd), resident(b2t),
            resident(w3bd), resident(b3t),
        ],
        out_specs=moving,                       # lane-dense output tile
        compiler_params=pltpu.CompilerParams(
            dimension_semantics=("parallel",),
        ),
    )(x_flat, w1bd, b1t, w2bd, b2t, w3bd, b3t)

    out = out_flat.reshape(Bp, num_state)       # free reshape back to batch-major
    return out[:B] if Bp != B else out


def init_linear(key, fan_in, fan_out):
    """PyTorch-style Kaiming-uniform init. Returns W [out, in], b [out]."""
    kw, kb = jax.random.split(key)
    bound = 1.0 / math.sqrt(fan_in)
    w = jax.random.uniform(kw, (fan_out, fan_in), jnp.float32, -bound, bound)
    b = jax.random.uniform(kb, (fan_out,), jnp.float32, -bound, bound)
    return w, b


def _reference(x, w1, b1, w2, b2, w3, b3):
    h = jnp.maximum(x @ w1.T + b1, 0.0)
    h = jnp.maximum(h @ w2.T + b2, 0.0)
    return h @ w3.T + b3


if __name__ == "__main__":
    num_state, h1, h2 = 16, 32, 32

    key = jax.random.PRNGKey(0)
    kx, kx2, kx3, k1, k2, k3 = jax.random.split(key, 6)

    w1, b1 = init_linear(k1, num_state, h1)
    w2, b2 = init_linear(k2, h1, h2)
    w3, b3 = init_linear(k3, h2, num_state)

    # --- small batch, exact f32 MXU path --------------------------------------
    x = jax.random.normal(kx, (8, num_state), jnp.float32)
    out = jax.block_until_ready(
        mlp_forward(x, w1, b1, w2, b2, w3, b3, mxu_dtype=jnp.float32))
    ref = _reference(x, w1, b1, w2, b2, w3, b3)
    assert out.shape == (8, num_state)
    assert jnp.allclose(out, ref, atol=1e-4, rtol=1e-4)

    # --- batch not a multiple of 8 -> pad + masked partial tile (bf16 default) -
    x2 = jax.random.normal(kx2, (1001, num_state), jnp.float32)
    out2 = jax.block_until_ready(mlp_forward(x2, w1, b1, w2, b2, w3, b3))
    ref2 = _reference(x2, w1, b1, w2, b2, w3, b3)
    assert out2.shape == (1001, num_state)
    assert jnp.allclose(out2, ref2, atol=2e-2, rtol=2e-2)

    # --- multi-step pipelined grid (4 even steps), bf16 MXU, f32 accumulation --
    x3 = jax.random.normal(kx3, (4096, num_state), jnp.float32)
    out3 = jax.block_until_ready(mlp_forward(x3, w1, b1, w2, b2, w3, b3, tb=1024))
    ref3 = _reference(x3, w1, b1, w2, b2, w3, b3)
    assert out3.shape == (4096, num_state)
    assert jnp.allclose(out3, ref3, atol=2e-2, rtol=2e-2)

    print("KERNEL_OK")
</pallas_src>

<mosaic_0001>
module attributes {stable_mosaic.version = 11 : i64} {
  func.func @_mlp_kernel(%arg0: i32, %arg1: memref<8x128xf32, #tpu.memory_space<vmem>>, %arg2: memref<128x256xf32, #tpu.memory_space<vmem>>, %arg3: memref<1x256xf32, #tpu.memory_space<vmem>>, %arg4: memref<256x256xf32, #tpu.memory_space<vmem>>, %arg5: memref<1x256xf32, #tpu.memory_space<vmem>>, %arg6: memref<256x128xf32, #tpu.memory_space<vmem>>, %arg7: memref<1x128xf32, #tpu.memory_space<vmem>>, %arg8: memref<8x128xf32, #tpu.memory_space<vmem>>) attributes {dimension_semantics = [#tpu.dimension_semantics<parallel>], iteration_bounds = array<i64: 1>, scalar_prefetch = 0 : i64, scratch_operands = 0 : i64, tpu.core_type = #tpu.core_type<tc>, window_params = [{transform_indices = @transform_0, window_bounds = array<i64: 8, 128>}, {pipeline_mode = #tpu.pipeline_mode<synchronous>, transform_indices = @transform_1, window_bounds = array<i64: 128, 256>}, {pipeline_mode = #tpu.pipeline_mode<synchronous>, transform_indices = @transform_2, window_bounds = array<i64: 1, 256>}, {pipeline_mode = #tpu.pipeline_mode<synchronous>, transform_indices = @transform_3, window_bounds = array<i64: 256, 256>}, {pipeline_mode = #tpu.pipeline_mode<synchronous>, transform_indices = @transform_4, window_bounds = array<i64: 1, 256>}, {pipeline_mode = #tpu.pipeline_mode<synchronous>, transform_indices = @transform_5, window_bounds = array<i64: 256, 128>}, {pipeline_mode = #tpu.pipeline_mode<synchronous>, transform_indices = @transform_6, window_bounds = array<i64: 1, 128>}, {transform_indices = @transform_7, window_bounds = array<i64: 8, 128>}]} {
    %c0 = arith.constant 0 : index
    %c0_0 = arith.constant 0 : index
    %0 = vector.load %arg1[%c0, %c0_0] : memref<8x128xf32, #tpu.memory_space<vmem>>, vector<8x128xf32>
    %c0_1 = arith.constant 0 : index
    %c0_2 = arith.constant 0 : index
    %1 = vector.load %arg2[%c0_1, %c0_2] : memref<128x256xf32, #tpu.memory_space<vmem>>, vector<128x256xf32>
    %cst = arith.constant dense<0.000000e+00> : vector<8x256xf32>
    %2 = tpu.matmul %0, %1, %cst {dimension_numbers = #tpu.dot_dimension_numbers<[1], [0], [0], [1], [0, 0, 1, 1], [], []>} : vector<8x128xf32>, vector<128x256xf32>, vector<8x256xf32> -> vector<8x256xf32>
    %c0_3 = arith.constant 0 : index
    %c0_4 = arith.constant 0 : index
    %3 = vector.load %arg3[%c0_3, %c0_4] : memref<1x256xf32, #tpu.memory_space<vmem>>, vector<1x256xf32>
    %4 = vector.broadcast %3 : vector<1x256xf32> to vector<8x256xf32>
    %5 = arith.addf %2, %4 : vector<8x256xf32>
    %cst_5 = arith.constant 0.000000e+00 : f32
    %6 = vector.broadcast %cst_5 : f32 to vector<8x256xf32>
    %7 = arith.maximumf %5, %6 : vector<8x256xf32>
    %c0_6 = arith.constant 0 : index
    %c0_7 = arith.constant 0 : index
    %8 = vector.load %arg4[%c0_6, %c0_7] : memref<256x256xf32, #tpu.memory_space<vmem>>, vector<256x256xf32>
    %cst_8 = arith.constant dense<0.000000e+00> : vector<8x256xf32>
    %9 = tpu.matmul %7, %8, %cst_8 {dimension_numbers = #tpu.dot_dimension_numbers<[1], [0], [0], [1], [0, 0, 1, 1], [], []>} : vector<8x256xf32>, vector<256x256xf32>, vector<8x256xf32> -> vector<8x256xf32>
    %c0_9 = arith.constant 0 : index
    %c0_10 = arith.constant 0 : index
    %10 = vector.load %arg5[%c0_9, %c0_10] : memref<1x256xf32, #tpu.memory_space<vmem>>, vector<1x256xf32>
    %11 = vector.broadcast %10 : vector<1x256xf32> to vector<8x256xf32>
    %12 = arith.addf %9, %11 : vector<8x256xf32>
    %cst_11 = arith.constant 0.000000e+00 : f32
    %13 = vector.broadcast %cst_11 : f32 to vector<8x256xf32>
    %14 = arith.maximumf %12, %13 : vector<8x256xf32>
    %c0_12 = arith.constant 0 : index
    %c0_13 = arith.constant 0 : index
    %15 = vector.load %arg6[%c0_12, %c0_13] : memref<256x128xf32, #tpu.memory_space<vmem>>, vector<256x128xf32>
    %cst_14 = arith.constant dense<0.000000e+00> : vector<8x128xf32>
    %16 = tpu.matmul %14, %15, %cst_14 {dimension_numbers = #tpu.dot_dimension_numbers<[1], [0], [0], [1], [0, 0, 1, 1], [], []>} : vector<8x256xf32>, vector<256x128xf32>, vector<8x128xf32> -> vector<8x128xf32>
    %c0_15 = arith.constant 0 : index
    %c0_16 = arith.constant 0 : index
    %17 = vector.load %arg7[%c0_15, %c0_16] : memref<1x128xf32, #tpu.memory_space<vmem>>, vector<1x128xf32>
    %18 = vector.broadcast %17 : vector<1x128xf32> to vector<8x128xf32>
    %19 = arith.addf %16, %18 : vector<8x128xf32>
    %c0_17 = arith.constant 0 : index
    %c0_18 = arith.constant 0 : index
    %20 = vector.load %arg8[%c0_17, %c0_18] : memref<8x128xf32, #tpu.memory_space<vmem>>, vector<8x128xf32>
    tpu.vector_store %arg8[%c0_17, %c0_18], %19 {strides = array<i32>} : memref<8x128xf32, #tpu.memory_space<vmem>>, vector<8x128xf32>,
    return
  }
  func.func @transform_0(%arg0: i32) -> (i32, i32) {
    %c0_i32 = arith.constant 0 : i32
    %c0_i32_0 = arith.constant 0 : i32
    return %arg0, %c0_i32 : i32, i32
  }
  func.func @transform_1(%arg0: i32) -> (i32, i32) {
    %c0_i32 = arith.constant 0 : i32
    %c0_i32_0 = arith.constant 0 : i32
    %c0_i32_1 = arith.constant 0 : i32
    return %c0_i32, %c0_i32_0 : i32, i32
  }
  func.func @transform_2(%arg0: i32) -> (i32, i32) {
    %c0_i32 = arith.constant 0 : i32
    %c0_i32_0 = arith.constant 0 : i32
    %c0_i32_1 = arith.constant 0 : i32
    return %c0_i32, %c0_i32_0 : i32, i32
  }
  func.func @transform_3(%arg0: i32) -> (i32, i32) {
    %c0_i32 = arith.constant 0 : i32
    %c0_i32_0 = arith.constant 0 : i32
    %c0_i32_1 = arith.constant 0 : i32
    return %c0_i32, %c0_i32_0 : i32, i32
  }
  func.func @transform_4(%arg0: i32) -> (i32, i32) {
    %c0_i32 = arith.constant 0 : i32
    %c0_i32_0 = arith.constant 0 : i32
    %c0_i32_1 = arith.constant 0 : i32
    return %c0_i32, %c0_i32_0 : i32, i32
  }
  func.func @transform_5(%arg0: i32) -> (i32, i32) {
    %c0_i32 = arith.constant 0 : i32
    %c0_i32_0 = arith.constant 0 : i32
    %c0_i32_1 = arith.constant 0 : i32
    return %c0_i32, %c0_i32_0 : i32, i32
  }
  func.func @transform_6(%arg0: i32) -> (i32, i32) {
    %c0_i32 = arith.constant 0 : i32
    %c0_i32_0 = arith.constant 0 : i32
    %c0_i32_1 = arith.constant 0 : i32
    return %c0_i32, %c0_i32_0 : i32, i32
  }
  func.func @transform_7(%arg0: i32) -> (i32, i32) {
    %c0_i32 = arith.constant 0 : i32
    %c0_i32_0 = arith.constant 0 : i32
    return %arg0, %c0_i32 : i32, i32
  }
}

</mosaic_0001>

<bundles_post_ra>
// kernel: tile.18
= control target key start
LH: loop header
LB: loop body
LE: loop exit
PB: predicated region body
PF: predicated region fallthrough
CT: control target
= control target key end

     0   :  { %s22_s0 = inlined_call_operand.vmem [shape: f32[32], index: 0, kind: input, shape index: {}]   ;;  %s23_s1 = inlined_call_operand.vmem [shape: f32[8,32], index: 1, kind: output, shape index: {}]  }
   0x1   :  { %v4_v0 = vld [vmem:[%s22_s0] ss:$0 sm:$0xff] }
   0x2   :  { %5 = vst [vmem:[%s23_s1] sm:$0xff] %v4_v0 }

// kernel: tile.19
= control target key start
LH: loop header
LB: loop body
LE: loop exit
PB: predicated region body
PF: predicated region fallthrough
CT: control target
= control target key end

     0   :  { %s7_s6 = smov 3  ;;  %s14_s9 = smov 3  ;;  %vm4_vm0 = vcmask 261120   ;;  %vm11_vm1 = vcmask 1048320   ;;  %vm18_vm2 = vcmask 785920   ;;  %vm25_vm3 = vcmask 523520   ;;  %s76_s0 = inlined_call_operand.vmem [shape: f32[8,32], index: 0, kind: input, shape index: {}]   ;;  %s77_s1 = inlined_call_operand.vmem [shape: f32[1,256], index: 1, kind: output, shape index: {}]  }
   0x1   :  { %v38_v0 = vld [vmem:[%s76_s0 + $0x3] ss:$4 sm:%s7_s6]   ;;  %s45_s10 = smov 96   ;;  %s21_s11 = smov 3  ;;  %v39_v1 = vld [vmem:[%s76_s0 + $0x2] ss:$4 sm:%s14_s9]  }
   0x2   :  { %9 = vrot.lane.b32.xlu0 %v38_v0, %s45_s10  ;;  %v40_v2 = vld [vmem:[%s76_s0 + $0x1] ss:$4 sm:%s21_s11]   ;;  %s2_s16 = smov 3  ;;  %s46_s17 = smov 32  }
   0x3   :  { %23 = vrot.lane.b32.xlu1 %v40_v2, %s46_s17  ;;  %v3_v3 = vld [vmem:[%s76_s0] ss:$4 sm:%s2_s16]   ;;  %s47_s0 = smov 64  }
   0x4   :  { %5 = vst.msk [vmem:[#allocation0] ss:$8 sm:$0x3] %vm4_vm0, %v3_v3  }
   0x6   :  { %16 = vrot.lane.b32.xlu0 %v39_v1, %s47_s0 }
  0x74   :  { %v10_v4 = vpop.permute.xlu0 %9  }
  0x75   :  { %12 = vst.msk [vmem:[#allocation0] ss:$8 sm:$0x3] %vm11_vm1, %v10_v4   ;;  %v24_v5 = vpop.permute.xlu1 %23  }
  0x78   :  { %v17_v6 = vpop.permute.xlu0 %16  }
  0x79   :  { %19 = vst.msk [vmem:[#allocation0] ss:$8 sm:$0x3] %vm18_vm2, %v17_v6  }
  0x7a   :  { %26 = vst.msk [vmem:[#allocation0] ss:$8 sm:$0x3] %vm25_vm3, %v24_v5  }
  0x81   :  { %v30_v7 = vld [vmem:[#allocation0] sm:$0x1]  ;;  %v34_v8 = vld [vmem:[#allocation0 + $0x8] sm:$0x1] }
  0x82   :  { %32 = vst [vmem:[%s77_s1] sm:$0x1] %v30_v7  ;;  %41 = vst [vmem:[%s77_s1 + $0x1] sm:$0x1] %v34_v8 }

// kernel: tile.28
= control target key start
LH: loop header
LB: loop body
LE: loop exit
PB: predicated region body
PF: predicated region fallthrough
CT: control target
= control target key end

     0   :  { %s22_s0 = inlined_call_operand.vmem [shape: f32[16], index: 0, kind: input, shape index: {}]   ;;  %s23_s1 = inlined_call_operand.vmem [shape: f32[8,16], index: 1, kind: output, shape index: {}]  }
   0x1   :  { %v4_v0 = vld [vmem:[%s22_s0] ss:$0 sm:$0xff] }
   0x2   :  { %5 = vst [vmem:[%s23_s1] sm:$0xff] %v4_v0 }

// kernel: tile.29
= control target key start
LH: loop header
LB: loop body
LE: loop exit
PB: predicated region body
PF: predicated region fallthrough
CT: control target
= control target key end

     0   :  { %s67_s10 = smov 112   ;;  %s68_s11 = smov 80   ;;  %vm3_vm0 = vcmask 130048   ;;  %vm9_vm1 = vcmask 1048448   ;;  %vm15_vm2 = vcmask 917248   ;;  %vm21_vm3 = vcmask 786048   ;;  %s111_s0 = inlined_call_operand.vmem [shape: f32[8,16], index: 0, kind: input, shape index: {}]   ;;  %s112_s1 = inlined_call_operand.vmem [shape: f32[1,128], index: 1, kind: output, shape index: {}]  }
   0x1   :  { %v53_v0 = vld [vmem:[%s111_s0 + $0x7] sm:$0x1]   ;;  %v55_v1 = vld [vmem:[%s111_s0 + $0x5] sm:$0x1]   ;;  %v54_v2 = vld [vmem:[%s111_s0 + $0x6] sm:$0x1]  }
   0x2   :  { %7 = vrot.lane.b32.xlu0 %v53_v0, %s67_s10  ;;  %19 = vrot.lane.b32.xlu1 %v55_v1, %s68_s11  ;;  %v56_v3 = vld [vmem:[%s111_s0 + $0x4] sm:$0x1]   ;;  %v2_v4 = vld [vmem:[%s111_s0] sm:$0x1]   ;;  %s69_s18 = smov 96   ;;  %s70_s19 = smov 64  }
   0x3   :  { %4 = vst.msk [vmem:[#allocation0] sm:$0x1] %vm3_vm0, %v2_v4   ;;  %v57_v5 = vld [vmem:[%s111_s0 + $0x3] sm:$0x1]   ;;  %v58_v6 = vld [vmem:[%s111_s0 + $0x2] sm:$0x1]  }
   0x4   :  { %s71_s24 = smov 48   ;;  %s72_s25 = smov 32   ;;  %v59_v7 = vld [vmem:[%s111_s0 + $0x1] sm:$0x1]   ;;  %vm27_vm4 = vcmask 654848   ;;  %vm33_vm5 = vcmask 523648  }
   0x5   :  { %s73_s0 = smov 16   ;;  %vm39_vm6 = vcmask 392448   ;;  %vm45_vm7 = vcmask 261248  }
   0x6   :  { %13 = vrot.lane.b32.xlu0 %v54_v2, %s69_s18  ;;  %25 = vrot.lane.b32.xlu1 %v56_v3, %s70_s19 }
   0xa   :  { %31 = vrot.lane.b32.xlu0 %v57_v5, %s71_s24  ;;  %37 = vrot.lane.b32.xlu1 %v58_v6, %s72_s25 }
   0xe   :  { %43 = vrot.lane.b32.xlu0 %v59_v7, %s73_s0 }
  0x74   :  { %v8_v8 = vpop.permute.xlu0 %7   ;;  %v20_v9 = vpop.permute.xlu1 %19  }
  0x75   :  { %10 = vst.msk [vmem:[#allocation0] sm:$0x1] %vm9_vm1, %v8_v8  }
  0x78   :  { %v14_v10 = vpop.permute.xlu0 %13   ;;  %v26_v11 = vpop.permute.xlu1 %25  }
  0x79   :  { %16 = vst.msk [vmem:[#allocation0] sm:$0x1] %vm15_vm2, %v14_v10  }
  0x7a   :  { %22 = vst.msk [vmem:[#allocation0] sm:$0x1] %vm21_vm3, %v20_v9  }
  0x7b   :  { %28 = vst.msk [vmem:[#allocation0] sm:$0x1] %vm27_vm4, %v26_v11  }
  0x7c   :  { %v32_v12 = vpop.permute.xlu0 %31   ;;  %v38_v13 = vpop.permute.xlu1 %37  }
  0x7d   :  { %34 = vst.msk [vmem:[#allocation0] sm:$0x1] %vm33_vm5, %v32_v12  }
  0x7e   :  { %40 = vst.msk [vmem:[#allocation0] sm:$0x1] %vm39_vm6, %v38_v13  }
  0x80   :  { %v44_v14 = vpop.permute.xlu0 %43  }
  0x81   :  { %46 = vst.msk [vmem:[#allocation0] sm:$0x1] %vm45_vm7, %v44_v14  }
  0x88   :  { %v50_v15 = vld [vmem:[#allocation0] sm:$0x1] }
  0x89   :  { %52 = vst [vmem:[%s112_s1] sm:$0x1] %v50_v15 }

// kernel: mlp_forward.1
= control target key start
LH: loop header
LB: loop body
LE: loop exit
PB: predicated region body
PF: predicated region fallthrough
CT: control target
= control target key end

     0   :  { %v607_v7 = vmov 0.0   ;;  %s1047_s0 = inlined_call_operand.vmem [shape: f32[1,128], index: 0, kind: input, shape index: {}]   ;;  %s1048_s1 = inlined_call_operand.vmem [shape: f32[128,256], index: 1, kind: input, shape index: {}]   ;;  %s1049_s2 = inlined_call_operand.vmem [shape: f32[1,256], index: 2, kind: input, shape index: {}]   ;;  %s1050_s3 = inlined_call_operand.vmem [shape: f32[256,256], index: 3, kind: input, shape index: {}]   ;;  %s1051_s4 = inlined_call_operand.vmem [shape: f32[1,256], index: 4, kind: input, shape index: {}]   ;;  %s1052_s5 = inlined_call_operand.vmem [shape: f32[256,128], index: 5, kind: input, shape index: {}]   ;;  %s1053_s6 = inlined_call_operand.vmem [shape: f32[1,128], index: 6, kind: input, shape index: {}]   ;;  %s1054_s7 = inlined_call_operand.vmem [shape: f32[1,128], index: 7, kind: output, shape index: {}]  }
   0x1   :  { %v28_v0 = vld [vmem:[%s1048_s1 + $0x8] sm:$0xff]  ;;  %v30_v1 = vld [vmem:[%s1048_s1 + $0x18] sm:$0xff]  ;;  %v27_v2 = vld [vmem:[%s1048_s1] sm:$0xff]  ;;  %135 = vmatprep.mubr.f32.mxu0 %v607_v7 }
   0x2   :  { %v478_v3 = vpack.c.bf16 %v30_v1, %v28_v0  ;;  %v29_v4 = vld [vmem:[%s1048_s1 + $0x10] sm:$0xff]  ;;  %v32_v5 = vld [vmem:[%s1048_s1 + $0x28] sm:$0xff]  ;;  %v34_v6 = vld [vmem:[%s1048_s1 + $0x38] sm:$0xff] }
   0x3   :  { %v480_v8 = vpack.c.bf16 %v29_v4, %v27_v2  ;;  %v482_v9 = vpack.c.bf16 %v34_v6, %v32_v5  ;;  %v31_v10 = vld [vmem:[%s1048_s1 + $0x20] sm:$0xff]  ;;  %v33_v11 = vld [vmem:[%s1048_s1 + $0x30] sm:$0xff]  ;;  %v36_v12 = vld [vmem:[%s1048_s1 + $0x48] sm:$0xff] }
   0x4   :  { %479 = vmatprep.subr.bf16.mxu0 %v478_v3  ;;  %v38_v13 = vld [vmem:[%s1048_s1 + $0x58] sm:$0xff]  ;;  %v484_v14 = vpack.c.bf16 %v33_v11, %v31_v10  ;;  %v35_v16 = vld [vmem:[%s1048_s1 + $0x40] sm:$0xff]  ;;  %v37_v17 = vld [vmem:[%s1048_s1 + $0x50] sm:$0xff] }
   0x5   :  { %481 = vmatpush1.bf16.msra.mxu0 %v480_v8  ;;  %v486_v15 = vpack.c.bf16 %v38_v13, %v36_v12  ;;  %v40_v18 = vld [vmem:[%s1048_s1 + $0x68] sm:$0xff]  ;;  %v42_v19 = vld [vmem:[%s1048_s1 + $0x78] sm:$0xff]  ;;  %v488_v20 = vpack.c.bf16 %v37_v17, %v35_v16  ;;  %v39_v22 = vld [vmem:[%s1048_s1 + $0x60] sm:$0xff] }
   0x6   :  { %483 = vmatprep.subr.bf16.mxu0 %v482_v9  ;;  %v490_v21 = vpack.c.bf16 %v42_v19, %v40_v18  ;;  %v41_v23 = vld [vmem:[%s1048_s1 + $0x70] sm:$0xff]  ;;  %v44_v24 = vld [vmem:[%s1048_s1 + $0x88] sm:$0xff]  ;;  %v46_v25 = vld [vmem:[%s1048_s1 + $0x98] sm:$0xff] }
   0x7   :  { %v43_v26 = vld [vmem:[%s1048_s1 + $0x80] sm:$0xff]  ;;  %v45_v27 = vld [vmem:[%s1048_s1 + $0x90] sm:$0xff]  ;;  %v145_v28 = vld [vmem:[%s1050_s3 + $0x8] sm:$0xff]  ;;  %v492_v31 = vpack.c.bf16 %v41_v23, %v39_v22  ;;  %v494_v36 = vpack.c.bf16 %v46_v25, %v44_v24 }
   0x8   :  { %v147_v29 = vld [vmem:[%s1050_s3 + $0x18] sm:$0xff]  ;;  %v144_v30 = vld [vmem:[%s1050_s3] sm:$0xff]  ;;  %v146_v33 = vld [vmem:[%s1050_s3 + $0x10] sm:$0xff]  ;;  %v496_v46 = vpack.c.bf16 %v45_v27, %v43_v26 }
   0x9   :  { %485 = vmatpush1.bf16.msra.mxu0 %v484_v14  ;;  %v510_v32 = vpack.c.bf16 %v147_v29, %v145_v28  ;;  %v149_v34 = vld [vmem:[%s1050_s3 + $0x28] sm:$0xff]  ;;  %v151_v35 = vld [vmem:[%s1050_s3 + $0x38] sm:$0xff]  ;;  %v512_v37 = vpack.c.bf16 %v146_v33, %v144_v30  ;;  %v148_v39 = vld [vmem:[%s1050_s3 + $0x20] sm:$0xff] }
   0xa   :  { %487 = vmatprep.subr.bf16.mxu0 %v486_v15  ;;  %v514_v38 = vpack.c.bf16 %v151_v35, %v149_v34  ;;  %v150_v40 = vld [vmem:[%s1050_s3 + $0x30] sm:$0xff]  ;;  %v153_v41 = vld [vmem:[%s1050_s3 + $0x48] sm:$0xff]  ;;  %v50_v43 = vld [vmem:[%s1048_s1 + $0xb8] sm:$0xff] }
   0xb   :  { %v48_v42 = vld [vmem:[%s1048_s1 + $0xa8] sm:$0xff]  ;;  %511 = vmatprep.subr.bf16.mxu1 %v510_v32  ;;  %v155_v44 = vld [vmem:[%s1050_s3 + $0x58] sm:$0xff]  ;;  %v516_v45 = vpack.c.bf16 %v150_v40, %v148_v39  ;;  %v47_v47 = vld [vmem:[%s1048_s1 + $0xa0] sm:$0xff] }
   0xc   :  { %513 = vmatpush1.bf16.msra.mxu1 %v512_v37  ;;  %v518_v48 = vpack.c.bf16 %v155_v44, %v153_v41  ;;  %v152_v49 = vld [vmem:[%s1050_s3 + $0x40] sm:$0xff]  ;;  %v154_v50 = vld [vmem:[%s1050_s3 + $0x50] sm:$0xff]  ;;  %v498_v51 = vpack.c.bf16 %v50_v43, %v48_v42  ;;  %v157_v53 = vld [vmem:[%s1050_s3 + $0x68] sm:$0xff] }
   0xd   :  { %489 = vmatpush1.bf16.msra.mxu0 %v488_v20  ;;  %515 = vmatprep.subr.bf16.mxu1 %v514_v38  ;;  %v49_v52 = vld [vmem:[%s1048_s1 + $0xb0] sm:$0xff]  ;;  %v159_v54 = vld [vmem:[%s1050_s3 + $0x78] sm:$0xff]  ;;  %v52_v55 = vld [vmem:[%s1048_s1 + $0xc8] sm:$0xff]  ;;  %v520_v57 = vpack.c.bf16 %v154_v50, %v152_v49 }
   0xe   :  { %491 = vmatprep.subr.bf16.mxu0 %v490_v21  ;;  %v54_v56 = vld [vmem:[%s1048_s1 + $0xd8] sm:$0xff]  ;;  %v500_v58 = vpack.c.bf16 %v49_v52, %v47_v47  ;;  %v51_v59 = vld [vmem:[%s1048_s1 + $0xc0] sm:$0xff]  ;;  %v522_v60 = vpack.c.bf16 %v159_v54, %v157_v53  ;;  %v158_v62 = vld [vmem:[%s1050_s3 + $0x70] sm:$0xff] }
   0xf   :  { %v156_v61 = vld [vmem:[%s1050_s3 + $0x60] sm:$0xff]  ;;  %v502_v63 = vpack.c.bf16 %v54_v56, %v52_v55  ;;  %v53_v0 = vld [vmem:[%s1048_s1 + $0xd0] sm:$0xff]  ;;  %v161_v1 = vld [vmem:[%s1050_s3 + $0x88] sm:$0xff] }
  0x10   :  { %517 = vmatpush1.bf16.msra.mxu1 %v516_v45  ;;  %v163_v2 = vld [vmem:[%s1050_s3 + $0x98] sm:$0xff]  ;;  %v56_v3 = vld [vmem:[%s1048_s1 + $0xe8] sm:$0xff]  ;;  %v524_v5 = vpack.c.bf16 %v158_v62, %v156_v61  ;;  %v504_v6 = vpack.c.bf16 %v53_v0, %v51_v59  ;;  %v55_v7 = vld [vmem:[%s1048_s1 + $0xe0] sm:$0xff] }
  0x11   :  { %493 = vmatpush1.bf16.msra.mxu0 %v492_v31  ;;  %519 = vmatprep.subr.bf16.mxu1 %v518_v48  ;;  %v58_v4 = vld [vmem:[%s1048_s1 + $0xf8] sm:$0xff]  ;;  %v526_v8 = vpack.c.bf16 %v163_v2, %v161_v1  ;;  %v160_v9 = vld [vmem:[%s1050_s3 + $0x80] sm:$0xff]  ;;  %v162_v10 = vld [vmem:[%s1050_s3 + $0x90] sm:$0xff] }
  0x12   :  { %495 = vmatprep.subr.bf16.mxu0 %v494_v36  ;;  %v506_v11 = vpack.c.bf16 %v58_v4, %v56_v3  ;;  %v57_v12 = vld [vmem:[%s1048_s1 + $0xf0] sm:$0xff]  ;;  %v165_v13 = vld [vmem:[%s1050_s3 + $0xa8] sm:$0xff]  ;;  %v167_v14 = vld [vmem:[%s1050_s3 + $0xb8] sm:$0xff]  ;;  %v528_v15 = vpack.c.bf16 %v162_v10, %v160_v9 }
  0x13   :  { %v508_v16 = vpack.c.bf16 %v57_v12, %v55_v7  ;;  %v530_v17 = vpack.c.bf16 %v167_v14, %v165_v13  ;;  %v164_v18 = vld [vmem:[%s1050_s3 + $0xa0] sm:$0xff]  ;;  %v166_v19 = vld [vmem:[%s1050_s3 + $0xb0] sm:$0xff]  ;;  %v169_v20 = vld [vmem:[%s1050_s3 + $0xc8] sm:$0xff] }
  0x14   :  { %521 = vmatpush1.bf16.msra.mxu1 %v520_v57  ;;  %v171_v21 = vld [vmem:[%s1050_s3 + $0xd8] sm:$0xff]  ;;  %v532_v22 = vpack.c.bf16 %v166_v19, %v164_v18  ;;  %v26_v23 = vld [vmem:[%s1047_s0] sm:$0xff]  ;;  %v170_v26 = vld [vmem:[%s1050_s3 + $0xd0] sm:$0xff] }
  0x15   :  { %497 = vmatpush1.bf16.msra.mxu0 %v496_v46  ;;  %523 = vmatprep.subr.bf16.mxu1 %v522_v60  ;;  %v534_v24 = vpack.c.bf16 %v171_v21, %v169_v20  ;;  %v168_v25 = vld [vmem:[%s1050_s3 + $0xc0] sm:$0xff]  ;;  %v173_v27 = vld [vmem:[%s1050_s3 + $0xe8] sm:$0xff]  ;;  %v175_v28 = vld [vmem:[%s1050_s3 + $0xf8] sm:$0xff] }
  0x16   :  { %499 = vmatprep.subr.bf16.mxu0 %v498_v51  ;;  %v536_v29 = vpack.c.bf16 %v170_v26, %v168_v25  ;;  %v538_v30 = vpack.c.bf16 %v175_v28, %v173_v27  ;;  %v172_v31 = vld [vmem:[%s1050_s3 + $0xe0] sm:$0xff]  ;;  %v174_v32 = vld [vmem:[%s1050_s3 + $0xf0] sm:$0xff]  ;;  %v177_v33 = vld [vmem:[%s1050_s3 + $0x108] sm:$0xff] }
  0x17   :  { %v179_v34 = vld [vmem:[%s1050_s3 + $0x118] sm:$0xff]  ;;  %v540_v35 = vpack.c.bf16 %v174_v32, %v172_v31  ;;  %v176_v37 = vld [vmem:[%s1050_s3 + $0x100] sm:$0xff]  ;;  %v178_v38 = vld [vmem:[%s1050_s3 + $0x110] sm:$0xff] }
  0x18   :  { %525 = vmatpush1.bf16.msra.mxu1 %v524_v5  ;;  %v542_v36 = vpack.c.bf16 %v179_v34, %v177_v33  ;;  %v181_v39 = vld [vmem:[%s1050_s3 + $0x128] sm:$0xff]  ;;  %v183_v40 = vld [vmem:[%s1050_s3 + $0x138] sm:$0xff]  ;;  %v544_v41 = vpack.c.bf16 %v178_v38, %v176_v37  ;;  %v180_v43 = vld [vmem:[%s1050_s3 + $0x120] sm:$0xff] }
  0x19   :  { %501 = vmatpush1.bf16.msra.mxu0 %v500_v58  ;;  %527 = vmatprep.subr.bf16.mxu1 %v526_v8  ;;  %v546_v42 = vpack.c.bf16 %v183_v40, %v181_v39  ;;  %v182_v44 = vld [vmem:[%s1050_s3 + $0x130] sm:$0xff]  ;;  %v185_v45 = vld [vmem:[%s1050_s3 + $0x148] sm:$0xff]  ;;  %v187_v46 = vld [vmem:[%s1050_s3 + $0x158] sm:$0xff] }
  0x1a   :  { %503 = vmatprep.subr.bf16.mxu0 %v502_v63  ;;  %v548_v47 = vpack.c.bf16 %v182_v44, %v180_v43  ;;  %v550_v48 = vpack.c.bf16 %v187_v46, %v185_v45  ;;  %v184_v49 = vld [vmem:[%s1050_s3 + $0x140] sm:$0xff]  ;;  %v186_v50 = vld [vmem:[%s1050_s3 + $0x150] sm:$0xff]  ;;  %v189_v51 = vld [vmem:[%s1050_s3 + $0x168] sm:$0xff] }
  0x1b   :  { %v191_v52 = vld [vmem:[%s1050_s3 + $0x178] sm:$0xff]  ;;  %v552_v53 = vpack.c.bf16 %v186_v50, %v184_v49  ;;  %v188_v55 = vld [vmem:[%s1050_s3 + $0x160] sm:$0xff]  ;;  %v190_v56 = vld [vmem:[%s1050_s3 + $0x170] sm:$0xff] }
  0x1c   :  { %529 = vmatpush1.bf16.msra.mxu1 %v528_v15  ;;  %v554_v54 = vpack.c.bf16 %v191_v52, %v189_v51  ;;  %v193_v57 = vld [vmem:[%s1050_s3 + $0x188] sm:$0xff]  ;;  %v195_v58 = vld [vmem:[%s1050_s3 + $0x198] sm:$0xff]  ;;  %v556_v59 = vpack.c.bf16 %v190_v56, %v188_v55  ;;  %v192_v61 = vld [vmem:[%s1050_s3 + $0x180] sm:$0xff] }
  0x1d   :  { %505 = vmatpush1.bf16.msra.mxu0 %v504_v6  ;;  %531 = vmatprep.subr.bf16.mxu1 %v530_v17  ;;  %v558_v60 = vpack.c.bf16 %v195_v58, %v193_v57  ;;  %v194_v62 = vld [vmem:[%s1050_s3 + $0x190] sm:$0xff]  ;;  %v197_v63 = vld [vmem:[%s1050_s3 + $0x1a8] sm:$0xff]  ;;  %v199_v0 = vld [vmem:[%s1050_s3 + $0x1b8] sm:$0xff]  ;;  %v61_v57 = vlaneseq }
  0x1e   :  { %507 = vmatprep.subr.bf16.mxu0 %v506_v11  ;;  %v560_v1 = vpack.c.bf16 %v194_v62, %v192_v61  ;;  %v562_v2 = vpack.c.bf16 %v199_v0, %v197_v63  ;;  %v196_v3 = vld [vmem:[%s1050_s3 + $0x1a0] sm:$0xff]  ;;  %v198_v4 = vld [vmem:[%s1050_s3 + $0x1b0] sm:$0xff]  ;;  %v201_v5 = vld [vmem:[%s1050_s3 + $0x1c8] sm:$0xff] }
  0x1f   :  { %v203_v6 = vld [vmem:[%s1050_s3 + $0x1d8] sm:$0xff]  ;;  %v564_v7 = vpack.c.bf16 %v198_v4, %v196_v3  ;;  %v200_v9 = vld [vmem:[%s1050_s3 + $0x1c0] sm:$0xff]  ;;  %v202_v10 = vld [vmem:[%s1050_s3 + $0x1d0] sm:$0xff]  ;;  %v62_v58 = vshrl.u32 %v61_v57, 7 }
  0x20   :  { %533 = vmatpush1.bf16.msra.mxu1 %v532_v22  ;;  %v566_v8 = vpack.c.bf16 %v203_v6, %v201_v5  ;;  %v568_v11 = vpack.c.bf16 %v202_v10, %v200_v9  ;;  %v205_v12 = vld [vmem:[%s1050_s3 + $0x1e8] sm:$0xff]  ;;  %v207_v13 = vld [vmem:[%s1050_s3 + $0x1f8] sm:$0xff]  ;;  %v204_v15 = vld [vmem:[%s1050_s3 + $0x1e0] sm:$0xff] }
  0x21   :  { %509 = vmatpush1.bf16.msra.mxu0 %v508_v16  ;;  %535 = vmatprep.subr.bf16.mxu1 %v534_v24  ;;  %v570_v14 = vpack.c.bf16 %v207_v13, %v205_v12  ;;  %v206_v16 = vld [vmem:[%s1050_s3 + $0x1f0] sm:$0xff]  ;;  %v309_v18 = vld [vmem:[%s1052_s5 + $0x80] sm:$0xff]  ;;  %v310_v19 = vld [vmem:[%s1052_s5 + $0x88] sm:$0xff]  ;;  %v67_v61 = vsub.s32 1, %v62_v58 }
  0x22   :  { %v572_v17 = vpack.c.bf16 %v206_v16, %v204_v15  ;;  %v293_v20 = vld [vmem:[%s1052_s5] sm:$0xff]  ;;  %v574_v21 = vpack.c.bf16 %v310_v19, %v309_v18  ;;  %v294_v22 = vld [vmem:[%s1052_s5 + $0x8] sm:$0xff]  ;;  %v312_v24 = vld [vmem:[%s1052_s5 + $0x98] sm:$0xff] }
  0x23   :  { %v576_v25 = vpack.c.bf16 %v294_v22, %v293_v20  ;;  %v295_v27 = vld [vmem:[%s1052_s5 + $0x10] sm:$0xff]  ;;  %v296_v28 = vld [vmem:[%s1052_s5 + $0x18] sm:$0xff]  ;;  %v297_v33 = vld [vmem:[%s1052_s5 + $0x20] sm:$0xff] }
  0x24   :  { %136 = vmatmul.mubr.f32.vlgmr.msra.gmra.mrb[0].mxu0 %v26_v23  ;;  %537 = vmatpush1.bf16.msra.mxu1 %v536_v29  ;;  %v311_v23 = vld [vmem:[%s1052_s5 + $0x90] sm:$0xff]  ;;  %v313_v29 = vld [vmem:[%s1052_s5 + $0xa0] sm:$0xff]  ;;  %v580_v31 = vpack.c.bf16 %v296_v28, %v295_v27  ;;  %v298_v34 = vld [vmem:[%s1052_s5 + $0x28] sm:$0xff] }
  0x25   :  { %539 = vmatprep.subr.bf16.mxu1 %v538_v30  ;;  %v578_v26 = vpack.c.bf16 %v312_v24, %v311_v23  ;;  %575 = vmatprep.subr.bf16.mxu0 %v574_v21  ;;  %v314_v30 = vld [vmem:[%s1052_s5 + $0xa8] sm:$0xff]  ;;  %v584_v37 = vpack.c.bf16 %v298_v34, %v297_v33  ;;  %v299_v39 = vld [vmem:[%s1052_s5 + $0x30] sm:$0xff]  ;;  %v300_v40 = vld [vmem:[%s1052_s5 + $0x38] sm:$0xff] }
  0x26   :  { %577 = vmatpush3.bf16.msra.mxu0 %v576_v25  ;;  %v582_v32 = vpack.c.bf16 %v314_v30, %v313_v29  ;;  %v588_v43 = vpack.c.bf16 %v300_v40, %v299_v39  ;;  %v301_v45 = vld [vmem:[%s1052_s5 + $0x40] sm:$0xff]  ;;  %v302_v46 = vld [vmem:[%s1052_s5 + $0x48] sm:$0xff]  ;;  %v303_v51 = vld [vmem:[%s1052_s5 + $0x50] sm:$0xff] }
  0x27   :  { %579 = vmatprep.subr.bf16.mxu0 %v578_v26  ;;  %v592_v49 = vpack.c.bf16 %v302_v46, %v301_v45  ;;  %v304_v52 = vld [vmem:[%s1052_s5 + $0x58] sm:$0xff]  ;;  %v305_v6 = vld [vmem:[%s1052_s5 + $0x60] sm:$0xff]  ;;  %v323_v9 = vld [vmem:[%s1052_s5 + $0xf0] sm:$0xff] }
  0x28   :  { %541 = vmatpush1.bf16.msra.mxu1 %v540_v35  ;;  %v315_v35 = vld [vmem:[%s1052_s5 + $0xb0] sm:$0xff]  ;;  %v596_v55 = vpack.c.bf16 %v304_v52, %v303_v51  ;;  %v324_v10 = vld [vmem:[%s1052_s5 + $0xf8] sm:$0xff]  ;;  %v208_v15 = vld [vmem:[%s1051_s4] sm:$0x3] }
  0x29   :  { %543 = vmatprep.subr.bf16.mxu1 %v542_v36  ;;  %v316_v36 = vld [vmem:[%s1052_s5 + $0xb8] sm:$0xff]  ;;  %v307_v12 = vld [vmem:[%s1052_s5 + $0x70] sm:$0xff]  ;;  %v442_v25 = vld [vmem:[%s1053_s6] ss:$0 sm:$0xff] }
  0x2a   :  { %581 = vmatpush3.bf16.msra.mxu0 %v580_v31  ;;  %v586_v38 = vpack.c.bf16 %v316_v36, %v315_v35  ;;  %v308_v13 = vld [vmem:[%s1052_s5 + $0x78] sm:$0xff] }
  0x2b   :  { %583 = vmatprep.subr.bf16.mxu0 %v582_v32 }
  0x2c   :  { %545 = vmatpush1.bf16.msra.mxu1 %v544_v41  ;;  %v317_v41 = vld [vmem:[%s1052_s5 + $0xc0] sm:$0xff] }
  0x2d   :  { %547 = vmatprep.subr.bf16.mxu1 %v546_v42  ;;  %v318_v42 = vld [vmem:[%s1052_s5 + $0xc8] sm:$0xff] }
  0x2e   :  { %585 = vmatpush3.bf16.msra.mxu0 %v584_v37  ;;  %v590_v44 = vpack.c.bf16 %v318_v42, %v317_v41 }
  0x2f   :  { %587 = vmatprep.subr.bf16.mxu0 %v586_v38 }
  0x30   :  { %549 = vmatpush1.bf16.msra.mxu1 %v548_v47  ;;  %v319_v47 = vld [vmem:[%s1052_s5 + $0xd0] sm:$0xff] }
  0x31   :  { %551 = vmatprep.subr.bf16.mxu1 %v550_v48  ;;  %v320_v48 = vld [vmem:[%s1052_s5 + $0xd8] sm:$0xff] }
  0x32   :  { %589 = vmatpush3.bf16.msra.mxu0 %v588_v43  ;;  %v594_v50 = vpack.c.bf16 %v320_v48, %v319_v47 }
  0x33   :  { %591 = vmatprep.subr.bf16.mxu0 %v590_v44 }
  0x34   :  { %553 = vmatpush1.bf16.msra.mxu1 %v552_v53  ;;  %v321_v53 = vld [vmem:[%s1052_s5 + $0xe0] sm:$0xff] }
  0x35   :  { %555 = vmatprep.subr.bf16.mxu1 %v554_v54  ;;  %v322_v54 = vld [vmem:[%s1052_s5 + $0xe8] sm:$0xff] }
  0x36   :  { %593 = vmatpush3.bf16.msra.mxu0 %v592_v49  ;;  %v598_v56 = vpack.c.bf16 %v322_v54, %v321_v53 }
  0x37   :  { %595 = vmatprep.subr.bf16.mxu0 %v594_v50 }
  0x38   :  { %557 = vmatpush1.bf16.msra.mxu1 %v556_v59  ;;  %v63_v59 = vsub.s32 0, %v62_v58 }
  0x39   :  { %559 = vmatprep.subr.bf16.mxu1 %v558_v60  ;;  %v59_v60 = vld [vmem:[%s1049_s2] sm:$0x3] }
  0x3a   :  { %597 = vmatpush3.bf16.msra.mxu0 %v596_v55  ;;  %v64_v62 = vrot.slane %v59_v60, %v63_v59  ;;  %v68_v63 = vrot.slane %v59_v60, %v67_v61  ;;  %v213_v16 = vrot.slane %v208_v15, %v63_v59 }
  0x3b   :  { %599 = vmatprep.subr.bf16.mxu0 %v598_v56 }
  0x3c   :  { %561 = vmatpush1.bf16.msra.mxu1 %v560_v1 }
  0x3d   :  { %563 = vmatprep.subr.bf16.mxu1 %v562_v2 }
  0x40   :  { %565 = vmatpush1.bf16.msra.mxu1 %v564_v7  ;;  %v306_v7 = vld [vmem:[%s1052_s5 + $0x68] sm:$0xff] }
  0x41   :  { %567 = vmatprep.subr.bf16.mxu1 %v566_v8  ;;  %v600_v8 = vpack.c.bf16 %v306_v7, %v305_v6 }
  0x43   :  { %601 = vmatpush3.bf16.msra.mxu0 %v600_v8 }
  0x44   :  { %569 = vmatpush1.bf16.msra.mxu1 %v568_v11  ;;  %v602_v11 = vpack.c.bf16 %v324_v10, %v323_v9 }
  0x45   :  { %571 = vmatprep.subr.bf16.mxu1 %v570_v14  ;;  %v604_v14 = vpack.c.bf16 %v308_v13, %v307_v12 }
  0x46   :  { %603 = vmatprep.subr.bf16.mxu0 %v602_v11 }
  0x47   :  { %605 = vmatpush3.bf16.msra.mxu0 %v604_v14 }
  0x48   :  { %573 = vmatpush1.bf16.msra.mxu1 %v572_v17  ;;  %v217_v17 = vrot.slane %v208_v15, %v67_v61 }
  0xf7   :  { %v137_v0 = vpop.f32.mrb[0].mxu0 }
  0xf8   :  { %v138_v1 = vadd.f32 %v137_v0, %v64_v62  ;;  %v139_v2 = vpop.f32.mrb[1].mxu0 }
  0xf9   :  { %v140_v3 = vadd.f32 %v139_v2, %v68_v63 }
  0xfa   :  { %v142_v5 = vmax.f32 %v138_v1, 0.0 }
  0xfb   :  { %v143_v4 = vmax.f32 %v140_v3, 0.0 }
  0xfd   :  { %284 = vmatprep.mubr.f32.mxu1 %v143_v4 }
  0xfe   :  { %285 = vmatmul.mubr.f32.vlgmr.msra.gmra.mrb[0].mxu1 %v142_v5 }
 0x1d1   :  { %v286_v18 = vpop.f32.mrb[0].mxu1 }
 0x1d2   :  { %v287_v19 = vadd.f32 %v286_v18, %v213_v16  ;;  %v288_v20 = vpop.f32.mrb[1].mxu1 }
 0x1d3   :  { %v289_v21 = vadd.f32 %v288_v20, %v217_v17 }
 0x1d4   :  { %v291_v23 = vmax.f32 %v287_v19, 0.0 }
 0x1d5   :  { %v292_v22 = vmax.f32 %v289_v21, 0.0 }
 0x1d7   :  { %396 = vmatprep.mubr.f32.mxu0 %v292_v22 }
 0x1d8   :  { %397 = vmatmul.mubr.f32.vlgmr.msra.gmra.mrb[2].mxu0 %v291_v23 }
 0x2ab   :  { %v475_v24 = vpop.f32.mrb[2].mxu0 }
 0x2ac   :  { %v476_v26 = vpop.f32.mrb[3].mxu0 }
 0x2ad   :  { %v477_v27 = vadd.f32 %v476_v26, %v475_v24 }
 0x2af   :  { %v399_v28 = vadd.f32 %v477_v27, %v442_v25 }
 0x2b1   :  { %402 = vst [vmem:[#allocation2] sm:$0xff] %v399_v28 }
 0x2b8   :  { %v420_v29 = vld [vmem:[#allocation2] sm:$0x1] }
 0x2b9   :  { %421 = vst [vmem:[%s1054_s7] sm:$0x1] %v420_v29 }

</bundles_post_ra>
